<compile_context>
chip_gen: v7x
topology: tpu7x:2x2x1
jax: 0.10.0
libtpu: 0.0.40
codegen_flags: <defaults>
</compile_context>

<pallas_src>
import functools

import jax
import jax.numpy as jnp
from jax.experimental import pallas as pl
from jax.experimental.pallas import tpu as pltpu


def _spectral_corner_kernel(xr_ref, xi_ref, wr_ref, wpw_ref, wmw_ref,
                            or_ref, oi_ref):
    """One (corner, batch-tile) grid step.

    Block shapes seen by the kernel:
      xr_ref / xi_ref            : (1, bt, C_in,  M)   -- M = flattened, 128-padded mode plane
      wr_ref / wpw_ref / wmw_ref : (1, C_in, C_out, M) -- wr, wr+wi, wi-wr (precomputed)
      or_ref / oi_ref            : (1, bt, C_out, M)
    """
    bt = xr_ref.shape[1]
    c_in = xr_ref.shape[2]
    c_out = or_ref.shape[2]
    m = or_ref.shape[3]

    acc_r = jnp.zeros((bt, c_out, m), jnp.float32)
    acc_i = jnp.zeros((bt, c_out, m), jnp.float32)

    # Unrolled VPU broadcast-FMA over the (small, static) C_in reduction.
    for i in range(c_in):
        xr_i = xr_ref[0, :, i:i + 1, :]      # (bt, 1, M)
        xi_i = xi_ref[0, :, i:i + 1, :]      # (bt, 1, M)
        xs_i = xr_i + xi_i                   # cheap: (bt, 1, M), amortized over C_out

        wr_i = wr_ref[0, i:i + 1, :, :]      # (1, C_out, M)
        wpw_i = wpw_ref[0, i:i + 1, :, :]    # (1, C_out, M)  = wr + wi
        wmw_i = wmw_ref[0, i:i + 1, :, :]    # (1, C_out, M)  = wi - wr

        # Gauss 3-mult complex product (weight combos hoisted to the wrapper):
        #   k1 = wr*(xr+xi);  real += k1 - (wr+wi)*xi;  imag += k1 + (wi-wr)*xr
        k1 = wr_i * xs_i                     # (bt, C_out, M)
        acc_r = acc_r + (k1 - wpw_i * xi_i)
        acc_i = acc_i + (k1 + wmw_i * xr_i)

    or_ref[0] = acc_r
    oi_ref[0] = acc_i


def _pick_batch_tile(B, C_in, C_out, Mpad, budget_bytes=12 * 1024 * 1024):
    """Largest batch tile whose double-buffered working set fits the budget."""
    w_bytes = 3 * 2 * C_in * C_out * Mpad * 4          # 3 weight planes, 2 buffers
    per_b = (2 * C_in + 2 * C_out) * Mpad * 4 * 2      # x + out planes, 2 buffers
    avail = max(budget_bytes - w_bytes, per_b)
    return int(max(1, min(B, avail // per_b)))


@functools.partial(jax.jit, static_argnames=("modes1", "modes2"))
def spectral_conv2d(x, w1, w2, *, modes1, modes2):
    """Forward pass of SpectralConv2d. x: (B, C_in, H, W) f32; w1/w2 complex64."""
    B, C_in, H, W = x.shape
    C_out = w1.shape[1]
    Wh = W // 2 + 1

    x_ft = jnp.fft.rfft2(x)                                # (B, C_in, H, Wh) c64

    # Retained-mode corners only (trim before the kernel).
    x_lo = x_ft[:, :, :modes1, :modes2]                    # low  kx corner -> w1
    x_hi = x_ft[:, :, H - modes1:, :modes2]                 # high kx corner -> w2
    xc = jnp.stack([x_lo, x_hi], axis=0)                    # (2, B, Ci, m1, m2)
    wc = jnp.stack([w1, w2], axis=0)                        # (2, Ci, Co, m1, m2)

    # Flatten the mode plane onto lanes, pad to a multiple of 128 (lane-dense).
    M = modes1 * modes2
    Mpad = ((M + 127) // 128) * 128
    xc = xc.reshape(2, B, C_in, M)
    wc = wc.reshape(2, C_in, C_out, M)
    pad = [(0, 0), (0, 0), (0, 0), (0, Mpad - M)]
    xr = jnp.pad(jnp.real(xc), pad).astype(jnp.float32)
    xi = jnp.pad(jnp.imag(xc), pad).astype(jnp.float32)
    wr = jnp.pad(jnp.real(wc), pad).astype(jnp.float32)
    wi = jnp.pad(jnp.imag(wc), pad).astype(jnp.float32)

    # Gauss-trick weight combinations, precomputed once outside the kernel.
    wpw = wr + wi
    wmw = wi - wr

    # Batch tiling: bt elements per grid step; pad B up to a multiple of bt.
    bt = _pick_batch_tile(B, C_in, C_out, Mpad)
    n_bt = -(-B // bt)
    B_pad = n_bt * bt
    if B_pad != B:
        bpad = [(0, 0), (0, B_pad - B), (0, 0), (0, 0)]
        xr = jnp.pad(xr, bpad)
        xi = jnp.pad(xi, bpad)

    # Grid: corner axis (slow) x batch-tile axis (fast). The weight index_maps
    # ignore the batch axis, so weight tiles are not re-DMA'd across steps.
    grid = (2, n_bt)
    x_spec = pl.BlockSpec((1, bt, C_in, Mpad), lambda c, b: (c, b, 0, 0))
    w_spec = pl.BlockSpec((1, C_in, C_out, Mpad), lambda c, b: (c, 0, 0, 0))
    o_spec = pl.BlockSpec((1, bt, C_out, Mpad), lambda c, b: (c, b, 0, 0))

    flops = 2 * B * M * C_in * C_out * 8     # naive-complex-equivalent flop count
    bytes_accessed = 4 * (xr.size + xi.size + 3 * wr.size
                          + 2 * (2 * B_pad * C_out * Mpad))

    # Raise the scoped-VMEM limit only if the working set needs it.
    vmem_need = (3 * 2 * C_in * C_out * Mpad * 4
                 + (2 * C_in + 2 * C_out) * bt * Mpad * 4 * 2)
    vmem_limit = int(vmem_need * 3 // 2) if vmem_need > (12 << 20) else None

    out_r, out_i = pl.pallas_call(
        _spectral_corner_kernel,
        out_shape=(jax.ShapeDtypeStruct((2, B_pad, C_out, Mpad), jnp.float32),
                   jax.ShapeDtypeStruct((2, B_pad, C_out, Mpad), jnp.float32)),
        grid_spec=pltpu.PrefetchScalarGridSpec(
            num_scalar_prefetch=0,
            grid=grid,
            in_specs=[x_spec, x_spec, w_spec, w_spec, w_spec],
            out_specs=[o_spec, o_spec],
        ),
        compiler_params=pltpu.CompilerParams(
            # corner axis 'parallel' (shards across the 2 TCs on v7x); batch
            # 'arbitrary' so weight-tile reuse across consecutive steps holds.
            dimension_semantics=("parallel", "arbitrary"),
            vmem_limit_bytes=vmem_limit,
        ),
        cost_estimate=pl.CostEstimate(
            flops=flops, transcendentals=0, bytes_accessed=bytes_accessed),
    )(xr, xi, wr, wpw, wmw)

    out_c = jax.lax.complex(out_r, out_i)[:, :B, :, :M]
    out_c = out_c.reshape(2, B, C_out, modes1, modes2).astype(jnp.complex64)

    # Un-retained modes are exactly zero (written here, not left uninitialized).
    out_ft = jnp.zeros((B, C_out, H, Wh), dtype=jnp.complex64)
    out_ft = out_ft.at[:, :, :modes1, :modes2].set(out_c[0])
    out_ft = out_ft.at[:, :, H - modes1:, :modes2].set(out_c[1])

    return jnp.fft.irfft2(out_ft, s=(H, W))


def _reference(x, w1, w2, modes1, modes2):
    """Pure-JAX reference matching the PyTorch module exactly."""
    B, C_in, H, W = x.shape
    C_out = w1.shape[1]
    x_ft = jnp.fft.rfft2(x)
    out_ft = jnp.zeros((B, C_out, H, W // 2 + 1), dtype=jnp.complex64)
    out_ft = out_ft.at[:, :, :modes1, :modes2].set(
        jnp.einsum('bixy,ioxy->boxy', x_ft[:, :, :modes1, :modes2], w1))
    out_ft = out_ft.at[:, :, H - modes1:, :modes2].set(
        jnp.einsum('bixy,ioxy->boxy', x_ft[:, :, H - modes1:, :modes2], w2))
    return jnp.fft.irfft2(out_ft, s=(H, W))


if __name__ == "__main__":
    key = jax.random.PRNGKey(0)
    B, C_in, C_out, H, W = 2, 4, 4, 16, 16
    modes1, modes2 = 6, 6

    k1, k2, k3, k4, k5 = jax.random.split(key, 5)
    x = jax.random.normal(k1, (B, C_in, H, W), dtype=jnp.float32)
    scale = 1.0 / (C_in * C_out)
    w_shape = (C_in, C_out, modes1, modes2)
    w1 = (scale * (jax.random.uniform(k2, w_shape)
                   + 1j * jax.random.uniform(k3, w_shape))).astype(jnp.complex64)
    w2 = (scale * (jax.random.uniform(k4, w_shape)
                   + 1j * jax.random.uniform(k5, w_shape))).astype(jnp.complex64)

    y = spectral_conv2d(x, w1, w2, modes1=modes1, modes2=modes2)
    y = jax.block_until_ready(y)

    y_ref = _reference(x, w1, w2, modes1, modes2)
    err = float(jnp.max(jnp.abs(y - y_ref)))
    assert err < 1e-4, f"max abs error {err}"
    print("KERNEL_OK")
</pallas_src>

<mosaic_0001>
module attributes {stable_mosaic.version = 11 : i64} {
  func.func @_spectral_corner_kernel(%arg0: i32, %arg1: i32, %arg2: memref<1x2x4x128xf32, #tpu.memory_space<vmem>>, %arg3: memref<1x2x4x128xf32, #tpu.memory_space<vmem>>, %arg4: memref<1x4x4x128xf32, #tpu.memory_space<vmem>>, %arg5: memref<1x4x4x128xf32, #tpu.memory_space<vmem>>, %arg6: memref<1x4x4x128xf32, #tpu.memory_space<vmem>>, %arg7: memref<1x2x4x128xf32, #tpu.memory_space<vmem>>, %arg8: memref<1x2x4x128xf32, #tpu.memory_space<vmem>>) attributes {dimension_semantics = [#tpu.dimension_semantics<parallel>, #tpu.dimension_semantics<arbitrary>], iteration_bounds = array<i64: 2, 1>, scalar_prefetch = 0 : i64, scratch_operands = 0 : i64, tpu.core_type = #tpu.core_type<tc>, window_params = [{transform_indices = @transform_0, window_bounds = array<i64: 1, 2, 4, 128>}, {transform_indices = @transform_1, window_bounds = array<i64: 1, 2, 4, 128>}, {transform_indices = @transform_2, window_bounds = array<i64: 1, 4, 4, 128>}, {transform_indices = @transform_3, window_bounds = array<i64: 1, 4, 4, 128>}, {transform_indices = @transform_4, window_bounds = array<i64: 1, 4, 4, 128>}, {transform_indices = @transform_5, window_bounds = array<i64: 1, 2, 4, 128>}, {transform_indices = @transform_6, window_bounds = array<i64: 1, 2, 4, 128>}]} {
    %cst = arith.constant 0.000000e+00 : f32
    %0 = vector.broadcast %cst : f32 to vector<2x4x128xf32>
    %cst_0 = arith.constant 0.000000e+00 : f32
    %1 = vector.broadcast %cst_0 : f32 to vector<2x4x128xf32>
    %c0 = arith.constant 0 : index
    %c0_1 = arith.constant 0 : index
    %c0_2 = arith.constant 0 : index
    %c0_3 = arith.constant 0 : index
    %2 = vector.load %arg2[%c0, %c0_1, %c0_2, %c0_3] : memref<1x2x4x128xf32, #tpu.memory_space<vmem>>, vector<1x2x1x128xf32>
    %3 = vector.shape_cast %2 : vector<1x2x1x128xf32> to vector<2x1x128xf32>
    %c0_4 = arith.constant 0 : index
    %c0_5 = arith.constant 0 : index
    %c0_6 = arith.constant 0 : index
    %c0_7 = arith.constant 0 : index
    %4 = vector.load %arg3[%c0_4, %c0_5, %c0_6, %c0_7] : memref<1x2x4x128xf32, #tpu.memory_space<vmem>>, vector<1x2x1x128xf32>
    %5 = vector.shape_cast %4 : vector<1x2x1x128xf32> to vector<2x1x128xf32>
    %6 = arith.addf %3, %5 : vector<2x1x128xf32>
    %c0_8 = arith.constant 0 : index
    %c0_9 = arith.constant 0 : index
    %c0_10 = arith.constant 0 : index
    %c0_11 = arith.constant 0 : index
    %7 = vector.load %arg4[%c0_8, %c0_9, %c0_10, %c0_11] : memref<1x4x4x128xf32, #tpu.memory_space<vmem>>, vector<1x1x4x128xf32>
    %8 = vector.shape_cast %7 : vector<1x1x4x128xf32> to vector<1x4x128xf32>
    %c0_12 = arith.constant 0 : index
    %c0_13 = arith.constant 0 : index
    %c0_14 = arith.constant 0 : index
    %c0_15 = arith.constant 0 : index
    %9 = vector.load %arg5[%c0_12, %c0_13, %c0_14, %c0_15] : memref<1x4x4x128xf32, #tpu.memory_space<vmem>>, vector<1x1x4x128xf32>
    %10 = vector.shape_cast %9 : vector<1x1x4x128xf32> to vector<1x4x128xf32>
    %c0_16 = arith.constant 0 : index
    %c0_17 = arith.constant 0 : index
    %c0_18 = arith.constant 0 : index
    %c0_19 = arith.constant 0 : index
    %11 = vector.load %arg6[%c0_16, %c0_17, %c0_18, %c0_19] : memref<1x4x4x128xf32, #tpu.memory_space<vmem>>, vector<1x1x4x128xf32>
    %12 = vector.shape_cast %11 : vector<1x1x4x128xf32> to vector<1x4x128xf32>
    %13 = vector.broadcast %8 : vector<1x4x128xf32> to vector<2x4x128xf32>
    %14 = vector.broadcast %6 : vector<2x1x128xf32> to vector<2x4x128xf32>
    %15 = arith.mulf %13, %14 : vector<2x4x128xf32>
    %16 = vector.broadcast %10 : vector<1x4x128xf32> to vector<2x4x128xf32>
    %17 = vector.broadcast %5 : vector<2x1x128xf32> to vector<2x4x128xf32>
    %18 = arith.mulf %16, %17 : vector<2x4x128xf32>
    %19 = arith.subf %15, %18 : vector<2x4x128xf32>
    %20 = arith.addf %0, %19 : vector<2x4x128xf32>
    %21 = vector.broadcast %12 : vector<1x4x128xf32> to vector<2x4x128xf32>
    %22 = vector.broadcast %3 : vector<2x1x128xf32> to vector<2x4x128xf32>
    %23 = arith.mulf %21, %22 : vector<2x4x128xf32>
    %24 = arith.addf %15, %23 : vector<2x4x128xf32>
    %25 = arith.addf %1, %24 : vector<2x4x128xf32>
    %c0_20 = arith.constant 0 : index
    %c0_21 = arith.constant 0 : index
    %c1 = arith.constant 1 : index
    %c0_22 = arith.constant 0 : index
    %26 = vector.load %arg2[%c0_20, %c0_21, %c1, %c0_22] : memref<1x2x4x128xf32, #tpu.memory_space<vmem>>, vector<1x2x1x128xf32>
    %27 = vector.shape_cast %26 : vector<1x2x1x128xf32> to vector<2x1x128xf32>
    %c0_23 = arith.constant 0 : index
    %c0_24 = arith.constant 0 : index
    %c1_25 = arith.constant 1 : index
    %c0_26 = arith.constant 0 : index
    %28 = vector.load %arg3[%c0_23, %c0_24, %c1_25, %c0_26] : memref<1x2x4x128xf32, #tpu.memory_space<vmem>>, vector<1x2x1x128xf32>
    %29 = vector.shape_cast %28 : vector<1x2x1x128xf32> to vector<2x1x128xf32>
    %30 = arith.addf %27, %29 : vector<2x1x128xf32>
    %c0_27 = arith.constant 0 : index
    %c1_28 = arith.constant 1 : index
    %c0_29 = arith.constant 0 : index
    %c0_30 = arith.constant 0 : index
    %31 = vector.load %arg4[%c0_27, %c1_28, %c0_29, %c0_30] : memref<1x4x4x128xf32, #tpu.memory_space<vmem>>, vector<1x1x4x128xf32>
    %32 = vector.shape_cast %31 : vector<1x1x4x128xf32> to vector<1x4x128xf32>
    %c0_31 = arith.constant 0 : index
    %c1_32 = arith.constant 1 : index
    %c0_33 = arith.constant 0 : index
    %c0_34 = arith.constant 0 : index
    %33 = vector.load %arg5[%c0_31, %c1_32, %c0_33, %c0_34] : memref<1x4x4x128xf32, #tpu.memory_space<vmem>>, vector<1x1x4x128xf32>
    %34 = vector.shape_cast %33 : vector<1x1x4x128xf32> to vector<1x4x128xf32>
    %c0_35 = arith.constant 0 : index
    %c1_36 = arith.constant 1 : index
    %c0_37 = arith.constant 0 : index
    %c0_38 = arith.constant 0 : index
    %35 = vector.load %arg6[%c0_35, %c1_36, %c0_37, %c0_38] : memref<1x4x4x128xf32, #tpu.memory_space<vmem>>, vector<1x1x4x128xf32>
    %36 = vector.shape_cast %35 : vector<1x1x4x128xf32> to vector<1x4x128xf32>
    %37 = vector.broadcast %32 : vector<1x4x128xf32> to vector<2x4x128xf32>
    %38 = vector.broadcast %30 : vector<2x1x128xf32> to vector<2x4x128xf32>
    %39 = arith.mulf %37, %38 : vector<2x4x128xf32>
    %40 = vector.broadcast %34 : vector<1x4x128xf32> to vector<2x4x128xf32>
    %41 = vector.broadcast %29 : vector<2x1x128xf32> to vector<2x4x128xf32>
    %42 = arith.mulf %40, %41 : vector<2x4x128xf32>
    %43 = arith.subf %39, %42 : vector<2x4x128xf32>
    %44 = arith.addf %20, %43 : vector<2x4x128xf32>
    %45 = vector.broadcast %36 : vector<1x4x128xf32> to vector<2x4x128xf32>
    %46 = vector.broadcast %27 : vector<2x1x128xf32> to vector<2x4x128xf32>
    %47 = arith.mulf %45, %46 : vector<2x4x128xf32>
    %48 = arith.addf %39, %47 : vector<2x4x128xf32>
    %49 = arith.addf %25, %48 : vector<2x4x128xf32>
    %c0_39 = arith.constant 0 : index
    %c0_40 = arith.constant 0 : index
    %c2 = arith.constant 2 : index
    %c0_41 = arith.constant 0 : index
    %50 = vector.load %arg2[%c0_39, %c0_40, %c2, %c0_41] : memref<1x2x4x128xf32, #tpu.memory_space<vmem>>, vector<1x2x1x128xf32>
    %51 = vector.shape_cast %50 : vector<1x2x1x128xf32> to vector<2x1x128xf32>
    %c0_42 = arith.constant 0 : index
    %c0_43 = arith.constant 0 : index
    %c2_44 = arith.constant 2 : index
    %c0_45 = arith.constant 0 : index
    %52 = vector.load %arg3[%c0_42, %c0_43, %c2_44, %c0_45] : memref<1x2x4x128xf32, #tpu.memory_space<vmem>>, vector<1x2x1x128xf32>
    %53 = vector.shape_cast %52 : vector<1x2x1x128xf32> to vector<2x1x128xf32>
    %54 = arith.addf %51, %53 : vector<2x1x128xf32>
    %c0_46 = arith.constant 0 : index
    %c2_47 = arith.constant 2 : index
    %c0_48 = arith.constant 0 : index
    %c0_49 = arith.constant 0 : index
    %55 = vector.load %arg4[%c0_46, %c2_47, %c0_48, %c0_49] : memref<1x4x4x128xf32, #tpu.memory_space<vmem>>, vector<1x1x4x128xf32>
    %56 = vector.shape_cast %55 : vector<1x1x4x128xf32> to vector<1x4x128xf32>
    %c0_50 = arith.constant 0 : index
    %c2_51 = arith.constant 2 : index
    %c0_52 = arith.constant 0 : index
    %c0_53 = arith.constant 0 : index
    %57 = vector.load %arg5[%c0_50, %c2_51, %c0_52, %c0_53] : memref<1x4x4x128xf32, #tpu.memory_space<vmem>>, vector<1x1x4x128xf32>
    %58 = vector.shape_cast %57 : vector<1x1x4x128xf32> to vector<1x4x128xf32>
    %c0_54 = arith.constant 0 : index
    %c2_55 = arith.constant 2 : index
    %c0_56 = arith.constant 0 : index
    %c0_57 = arith.constant 0 : index
    %59 = vector.load %arg6[%c0_54, %c2_55, %c0_56, %c0_57] : memref<1x4x4x128xf32, #tpu.memory_space<vmem>>, vector<1x1x4x128xf32>
    %60 = vector.shape_cast %59 : vector<1x1x4x128xf32> to vector<1x4x128xf32>
    %61 = vector.broadcast %56 : vector<1x4x128xf32> to vector<2x4x128xf32>
    %62 = vector.broadcast %54 : vector<2x1x128xf32> to vector<2x4x128xf32>
    %63 = arith.mulf %61, %62 : vector<2x4x128xf32>
    %64 = vector.broadcast %58 : vector<1x4x128xf32> to vector<2x4x128xf32>
    %65 = vector.broadcast %53 : vector<2x1x128xf32> to vector<2x4x128xf32>
    %66 = arith.mulf %64, %65 : vector<2x4x128xf32>
    %67 = arith.subf %63, %66 : vector<2x4x128xf32>
    %68 = arith.addf %44, %67 : vector<2x4x128xf32>
    %69 = vector.broadcast %60 : vector<1x4x128xf32> to vector<2x4x128xf32>
    %70 = vector.broadcast %51 : vector<2x1x128xf32> to vector<2x4x128xf32>
    %71 = arith.mulf %69, %70 : vector<2x4x128xf32>
    %72 = arith.addf %63, %71 : vector<2x4x128xf32>
    %73 = arith.addf %49, %72 : vector<2x4x128xf32>
    %c0_58 = arith.constant 0 : index
    %c0_59 = arith.constant 0 : index
    %c3 = arith.constant 3 : index
    %c0_60 = arith.constant 0 : index
    %74 = vector.load %arg2[%c0_58, %c0_59, %c3, %c0_60] : memref<1x2x4x128xf32, #tpu.memory_space<vmem>>, vector<1x2x1x128xf32>
    %75 = vector.shape_cast %74 : vector<1x2x1x128xf32> to vector<2x1x128xf32>
    %c0_61 = arith.constant 0 : index
    %c0_62 = arith.constant 0 : index
    %c3_63 = arith.constant 3 : index
    %c0_64 = arith.constant 0 : index
    %76 = vector.load %arg3[%c0_61, %c0_62, %c3_63, %c0_64] : memref<1x2x4x128xf32, #tpu.memory_space<vmem>>, vector<1x2x1x128xf32>
    %77 = vector.shape_cast %76 : vector<1x2x1x128xf32> to vector<2x1x128xf32>
    %78 = arith.addf %75, %77 : vector<2x1x128xf32>
    %c0_65 = arith.constant 0 : index
    %c3_66 = arith.constant 3 : index
    %c0_67 = arith.constant 0 : index
    %c0_68 = arith.constant 0 : index
    %79 = vector.load %arg4[%c0_65, %c3_66, %c0_67, %c0_68] : memref<1x4x4x128xf32, #tpu.memory_space<vmem>>, vector<1x1x4x128xf32>
    %80 = vector.shape_cast %79 : vector<1x1x4x128xf32> to vector<1x4x128xf32>
    %c0_69 = arith.constant 0 : index
    %c3_70 = arith.constant 3 : index
    %c0_71 = arith.constant 0 : index
    %c0_72 = arith.constant 0 : index
    %81 = vector.load %arg5[%c0_69, %c3_70, %c0_71, %c0_72] : memref<1x4x4x128xf32, #tpu.memory_space<vmem>>, vector<1x1x4x128xf32>
    %82 = vector.shape_cast %81 : vector<1x1x4x128xf32> to vector<1x4x128xf32>
    %c0_73 = arith.constant 0 : index
    %c3_74 = arith.constant 3 : index
    %c0_75 = arith.constant 0 : index
    %c0_76 = arith.constant 0 : index
    %83 = vector.load %arg6[%c0_73, %c3_74, %c0_75, %c0_76] : memref<1x4x4x128xf32, #tpu.memory_space<vmem>>, vector<1x1x4x128xf32>
    %84 = vector.shape_cast %83 : vector<1x1x4x128xf32> to vector<1x4x128xf32>
    %85 = vector.broadcast %80 : vector<1x4x128xf32> to vector<2x4x128xf32>
    %86 = vector.broadcast %78 : vector<2x1x128xf32> to vector<2x4x128xf32>
    %87 = arith.mulf %85, %86 : vector<2x4x128xf32>
    %88 = vector.broadcast %82 : vector<1x4x128xf32> to vector<2x4x128xf32>
    %89 = vector.broadcast %77 : vector<2x1x128xf32> to vector<2x4x128xf32>
    %90 = arith.mulf %88, %89 : vector<2x4x128xf32>
    %91 = arith.subf %87, %90 : vector<2x4x128xf32>
    %92 = arith.addf %68, %91 : vector<2x4x128xf32>
    %93 = vector.broadcast %84 : vector<1x4x128xf32> to vector<2x4x128xf32>
    %94 = vector.broadcast %75 : vector<2x1x128xf32> to vector<2x4x128xf32>
    %95 = arith.mulf %93, %94 : vector<2x4x128xf32>
    %96 = arith.addf %87, %95 : vector<2x4x128xf32>
    %97 = arith.addf %73, %96 : vector<2x4x128xf32>
    %c0_77 = arith.constant 0 : index
    %c0_78 = arith.constant 0 : index
    %c0_79 = arith.constant 0 : index
    %c0_80 = arith.constant 0 : index
    %98 = vector.load %arg7[%c0_77, %c0_78, %c0_79, %c0_80] : memref<1x2x4x128xf32, #tpu.memory_space<vmem>>, vector<1x2x4x128xf32>
    %99 = vector.shape_cast %98 : vector<1x2x4x128xf32> to vector<2x4x128xf32>
    %100 = vector.shape_cast %92 : vector<2x4x128xf32> to vector<1x2x4x128xf32>
    tpu.vector_store %arg7[%c0_77, %c0_78, %c0_79, %c0_80], %100 {strides = array<i32>} : memref<1x2x4x128xf32, #tpu.memory_space<vmem>>, vector<1x2x4x128xf32>,
    %c0_81 = arith.constant 0 : index
    %c0_82 = arith.constant 0 : index
    %c0_83 = arith.constant 0 : index
    %c0_84 = arith.constant 0 : index
    %101 = vector.load %arg8[%c0_81, %c0_82, %c0_83, %c0_84] : memref<1x2x4x128xf32, #tpu.memory_space<vmem>>, vector<1x2x4x128xf32>
    %102 = vector.shape_cast %101 : vector<1x2x4x128xf32> to vector<2x4x128xf32>
    %103 = vector.shape_cast %97 : vector<2x4x128xf32> to vector<1x2x4x128xf32>
    tpu.vector_store %arg8[%c0_81, %c0_82, %c0_83, %c0_84], %103 {strides = array<i32>} : memref<1x2x4x128xf32, #tpu.memory_space<vmem>>, vector<1x2x4x128xf32>,
    return
  }
  func.func @transform_0(%arg0: i32, %arg1: i32) -> (i32, i32, i32, i32) {
    %c0_i32 = arith.constant 0 : i32
    %c0_i32_0 = arith.constant 0 : i32
    %c0_i32_1 = arith.constant 0 : i32
    return %arg0, %arg1, %c0_i32, %c0_i32_0 : i32, i32, i32, i32
  }
  func.func @transform_1(%arg0: i32, %arg1: i32) -> (i32, i32, i32, i32) {
    %c0_i32 = arith.constant 0 : i32
    %c0_i32_0 = arith.constant 0 : i32
    %c0_i32_1 = arith.constant 0 : i32
    return %arg0, %arg1, %c0_i32, %c0_i32_0 : i32, i32, i32, i32
  }
  func.func @transform_2(%arg0: i32, %arg1: i32) -> (i32, i32, i32, i32) {
    %c0_i32 = arith.constant 0 : i32
    %c0_i32_0 = arith.constant 0 : i32
    %c0_i32_1 = arith.constant 0 : i32
    %c0_i32_2 = arith.constant 0 : i32
    return %arg0, %c0_i32, %c0_i32_0, %c0_i32_1 : i32, i32, i32, i32
  }
  func.func @transform_3(%arg0: i32, %arg1: i32) -> (i32, i32, i32, i32) {
    %c0_i32 = arith.constant 0 : i32
    %c0_i32_0 = arith.constant 0 : i32
    %c0_i32_1 = arith.constant 0 : i32
    %c0_i32_2 = arith.constant 0 : i32
    return %arg0, %c0_i32, %c0_i32_0, %c0_i32_1 : i32, i32, i32, i32
  }
  func.func @transform_4(%arg0: i32, %arg1: i32) -> (i32, i32, i32, i32) {
    %c0_i32 = arith.constant 0 : i32
    %c0_i32_0 = arith.constant 0 : i32
    %c0_i32_1 = arith.constant 0 : i32
    %c0_i32_2 = arith.constant 0 : i32
    return %arg0, %c0_i32, %c0_i32_0, %c0_i32_1 : i32, i32, i32, i32
  }
  func.func @transform_5(%arg0: i32, %arg1: i32) -> (i32, i32, i32, i32) {
    %c0_i32 = arith.constant 0 : i32
    %c0_i32_0 = arith.constant 0 : i32
    %c0_i32_1 = arith.constant 0 : i32
    return %arg0, %arg1, %c0_i32, %c0_i32_0 : i32, i32, i32, i32
  }
  func.func @transform_6(%arg0: i32, %arg1: i32) -> (i32, i32, i32, i32) {
    %c0_i32 = arith.constant 0 : i32
    %c0_i32_0 = arith.constant 0 : i32
    %c0_i32_1 = arith.constant 0 : i32
    return %arg0, %arg1, %c0_i32, %c0_i32_0 : i32, i32, i32, i32
  }
}

</mosaic_0001>

<bundles_post_ra>
// kernel: custom-call
= control target key start
LH: loop header
LB: loop body
LE: loop exit
PB: predicated region body
PF: predicated region fallthrough
CT: control target
= control target key end

     0   :  { %2 = vsyncpa [#allocation0], 0  ;;  %s61_s0 = inlined_call_operand.hbm [shape: c64[4,4,6,6], index: 0, kind: input, shape index: {}]   ;;  %s62_s1 = inlined_call_operand.vmem [shape: f32[4,4,6,6], index: 1, kind: output, shape index: {}]  }
   0x1   :  { %s3_s8 = sshll.u32 %s62_s1, 4  ;;  %s9_s11 = scalar_lea.hbm %s61_s0, 1536  ;;  %s4_s8 = int_to_ptr.vmem [resolvable:$true] %s3_s8 }
   0x2   :  { %p10_p0 = scmp.ne.s32.totalorder %s61_s0, %s9_s11  ;;  %s11_s16 = scalar_lea.hbm %s61_s0, 3072 }
   0x3   :  { %p12_p1 = scmp.lt.u32.totalorder %s11_s16, %s9_s11  ;;  %p13_p2 = scmp.lt.u32.totalorder %s9_s11, %s61_s0 }
   0x5   :  { %p14_p3 = por %p13_p2, %p12_p1 }
   0x7   :  { %p15_p4 = pnand %p14_p3, %p10_p0 }
   0x9   :  { %18 = shalt.err (!%p15_p4)  }
   0xa   :  { %s19_s1 = scalar_lea.vmem %s4_s8, 1536  ;;  %p24_p6 = scmp.lt.s32.totalorder %s4_s8, %s4_s8 }
   0xb   :  { %p20_p5 = scmp.ne.s32.totalorder %s4_s8, %s19_s1  ;;  %p25_p7 = scmp.lt.s32.totalorder %s19_s1, %s19_s1 }
   0xd   :  { %p26_p8 = por %p25_p7, %p24_p6 }
   0xf   :  { %p27_p9 = pnand %p26_p8, %p20_p5 }
  0x11   :  { %30 = shalt.err (!%p27_p9)  }
  0x12   :  { %6 = dma.hbm_to_vmem [thread:$0]  %s61_s0, 1536, %s4_s8, [#allocation0] }
  0x13   :  { %31 = dma.done.wait [#allocation0], 1536  }
  0x14   :  { %32 = vsyncadd [#allocation0], 4294965760 }
  0x15   :  { %8 = vsyncpa [#allocation0], 1 }

// kernel: custom-call.1
= control target key start
LH: loop header
LB: loop body
LE: loop exit
PB: predicated region body
PF: predicated region fallthrough
CT: control target
= control target key end

     0   :  { %s59_s0 = inlined_call_operand.hbm [shape: c64[4,4,6,6], index: 0, kind: input, shape index: {}]   ;;  %s60_s1 = inlined_call_operand.vmem [shape: f32[4,4,6,6], index: 1, kind: output, shape index: {}]  }
   0x1   :  { %s2_s8 = scalar_lea.hbm %s59_s0, 1536 }
   0x2   :  { %3 = vsyncpa [#allocation0], 0  ;;  %s4_s11 = sshll.u32 %s60_s1, 4  ;;  %s34_s14 = scalar_lea.hbm %s59_s0, 3072  ;;  %s5_s11 = int_to_ptr.vmem [resolvable:$true] %s4_s11 }
   0x3   :  { %p11_p0 = scmp.ne.s32.totalorder %s2_s8, %s34_s14  ;;  %p13_p1 = scmp.lt.u32.totalorder %s2_s8, %s59_s0 }
   0x4   :  { %p14_p2 = scmp.lt.u32.totalorder %s34_s14, %s34_s14  ;;  %p16_p4 = scmp.lt.u32.totalorder %s34_s14, %s2_s8 }
   0x6   :  { %p15_p3 = por %p14_p2, %p13_p1 }
   0x8   :  { %p17_p5 = por %p16_p4, %p15_p3 }
   0xa   :  { %p18_p6 = pnand %p17_p5, %p11_p0 }
   0xc   :  { %21 = shalt.err (!%p18_p6)  }
   0xd   :  { %s22_s17 = scalar_lea.vmem %s5_s11, 1536  ;;  %p27_p8 = scmp.lt.s32.totalorder %s5_s11, %s5_s11 }
   0xe   :  { %p23_p7 = scmp.ne.s32.totalorder %s5_s11, %s22_s17  ;;  %p28_p9 = scmp.lt.s32.totalorder %s22_s17, %s22_s17 }
  0x10   :  { %p29_p10 = por %p28_p9, %p27_p8 }
  0x12   :  { %p30_p11 = pnand %p29_p10, %p23_p7 }
  0x14   :  { %33 = shalt.err (!%p30_p11)  }
  0x15   :  { %7 = dma.hbm_to_vmem [thread:$0]  %s2_s8, 1536, %s5_s11, [#allocation0] }
  0x16   :  { %35 = dma.done.wait [#allocation0], 1536  }
  0x17   :  { %36 = vsyncadd [#allocation0], 4294965760 }
  0x18   :  { %9 = vsyncpa [#allocation0], 1 }

// kernel: reverse.0
= control target key start
LH: loop header
LB: loop body
LE: loop exit
PB: predicated region body
PF: predicated region fallthrough
CT: control target
= control target key end

     0   :  { %v71_v3 = vlaneseq  ;;  %v64_v9 = vld [vmem:[#allocation0 + $0x7] ss:$-1 sm:$0xff]  ;;  %v78_v12 = vld [vmem:[#allocation0 + $0x17] ss:$-1 sm:$0xff]  ;;  %s329_s0 = inlined_call_operand.vmem [shape: f32[2,4,16,7], index: 0, kind: input, shape index: {}]   ;;  %s330_s1 = inlined_call_operand.vmem [shape: f32[2,4,16,7], index: 1, kind: output, shape index: {}]  }
   0x1   :  { %v44_v0 = vld [vmem:[%s329_s0] sm:$0xff]  ;;  %v46_v1 = vld [vmem:[%s329_s0 + $0x8] sm:$0xff]  ;;  %v48_v2 = vld [vmem:[%s329_s0 + $0x10] sm:$0xff]  ;;  %v65_v10 = vrot.slane %v64_v9, 1  ;;  %v79_v14 = vrot.slane %v78_v12, 1 }
   0x2   :  { %45 = vst [vmem:[#allocation0 + $0x8] sm:$0xff] %v44_v0  ;;  %47 = vst [vmem:[#allocation0 + $0x18] sm:$0xff] %v46_v1  ;;  %v50_v4 = vld [vmem:[%s329_s0 + $0x18] sm:$0xff]  ;;  %v52_v5 = vld [vmem:[%s329_s0 + $0x20] sm:$0xff]  ;;  %v72_v11 = vshrl.u32 %v71_v3, 7 }
   0x3   :  { %49 = vst [vmem:[#allocation0 + $0x28] sm:$0xff] %v48_v2  ;;  %v54_v6 = vld [vmem:[%s329_s0 + $0x28] sm:$0xff]  ;;  %51 = vst [vmem:[#allocation0 + $0x38] sm:$0xff] %v50_v4  ;;  %v56_v7 = vld [vmem:[%s329_s0 + $0x30] sm:$0xff] }
   0x4   :  { %53 = vst [vmem:[#allocation0 + $0x48] sm:$0xff] %v52_v5  ;;  %55 = vst [vmem:[#allocation0 + $0x58] sm:$0xff] %v54_v6  ;;  %v58_v8 = vld [vmem:[%s329_s0 + $0x38] sm:$0xff]  ;;  %v92_v13 = vld [vmem:[#allocation0 + $0x27] ss:$-1 sm:$0xff]  ;;  %vm73_vm0 = vcmp.lt.s32.totalorder %v72_v11, 7 }
   0x5   :  { %57 = vst [vmem:[#allocation0 + $0x68] sm:$0xff] %v56_v7  ;;  %59 = vst [vmem:[#allocation0 + $0x78] sm:$0xff] %v58_v8  ;;  %v93_v15 = vrot.slane %v92_v13, 1  ;;  %v106_v16 = vld [vmem:[#allocation0 + $0x37] ss:$-1 sm:$0xff] }
   0x6   :  { %66 = vst [vmem:[#allocation1] sm:$0xff] %v65_v10  ;;  %v107_v17 = vrot.slane %v106_v16, 1  ;;  %v120_v18 = vld [vmem:[#allocation0 + $0x47] ss:$-1 sm:$0xff]  ;;  %v134_v19 = vld [vmem:[#allocation0 + $0x57] ss:$-1 sm:$0xff] }
   0x7   :  { %80 = vst [vmem:[#allocation1 + $0x8] sm:$0xff] %v79_v14  ;;  %94 = vst [vmem:[#allocation1 + $0x10] sm:$0xff] %v93_v15  ;;  %v121_v20 = vrot.slane %v120_v18, 1  ;;  %v135_v21 = vrot.slane %v134_v19, 1  ;;  %v148_v22 = vld [vmem:[#allocation0 + $0x67] ss:$-1 sm:$0xff] }
   0x8   :  { %v162_v23 = vld [vmem:[#allocation0 + $0x77] ss:$-1 sm:$0xff]  ;;  %108 = vst [vmem:[#allocation1 + $0x18] sm:$0xff] %v107_v17  ;;  %v149_v24 = vrot.slane %v148_v22, 1 }
   0x9   :  { %v163_v25 = vrot.slane %v162_v23, 1  ;;  %v69_v26 = vld [vmem:[#allocation0 + $0xf] ss:$-1 sm:$0xff]  ;;  %v83_v27 = vld [vmem:[#allocation0 + $0x1f] ss:$-1 sm:$0xff]  ;;  %122 = vst [vmem:[#allocation1 + $0x20] sm:$0xff] %v121_v20 }
   0xa   :  { %v97_v28 = vld [vmem:[#allocation0 + $0x2f] ss:$-1 sm:$0xff]  ;;  %136 = vst [vmem:[#allocation1 + $0x28] sm:$0xff] %v135_v21  ;;  %v70_v29 = vrot.slane %v69_v26, 1  ;;  %v84_v30 = vrot.slane %v83_v27, 1  ;;  %150 = vst [vmem:[#allocation1 + $0x30] sm:$0xff] %v149_v24 }
   0xb   :  { %v98_v31 = vrot.slane %v97_v28, 1  ;;  %v111_v32 = vld [vmem:[#allocation0 + $0x3f] ss:$-1 sm:$0xff]  ;;  %164 = vst [vmem:[#allocation1 + $0x38] sm:$0xff] %v163_v25  ;;  %v125_v34 = vld [vmem:[#allocation0 + $0x4f] ss:$-1 sm:$0xff] }
   0xc   :  { %v112_v33 = vrot.slane %v111_v32, 1  ;;  %v139_v35 = vld [vmem:[#allocation0 + $0x5f] ss:$-1 sm:$0xff]  ;;  %74 = vst.msk [vmem:[#allocation1] sm:$0xff] %vm73_vm0, %v70_v29  ;;  %88 = vst.msk [vmem:[#allocation1 + $0x8] sm:$0xff] %vm73_vm0, %v84_v30  ;;  %v126_v36 = vrot.slane %v125_v34, 1 }
   0xd   :  { %102 = vst.msk [vmem:[#allocation1 + $0x10] sm:$0xff] %vm73_vm0, %v98_v31  ;;  %v140_v37 = vrot.slane %v139_v35, 1  ;;  %v153_v38 = vld [vmem:[#allocation0 + $0x6f] ss:$-1 sm:$0xff]  ;;  %v167_v39 = vld [vmem:[#allocation0 + $0x7f] ss:$-1 sm:$0xff] }
   0xe   :  { %116 = vst.msk [vmem:[#allocation1 + $0x18] sm:$0xff] %vm73_vm0, %v112_v33  ;;  %v154_v40 = vrot.slane %v153_v38, 1  ;;  %v168_v41 = vrot.slane %v167_v39, 1  ;;  %130 = vst.msk [vmem:[#allocation1 + $0x20] sm:$0xff] %vm73_vm0, %v126_v36 }
   0xf   :  { %144 = vst.msk [vmem:[#allocation1 + $0x28] sm:$0xff] %vm73_vm0, %v140_v37 }
  0x10   :  { %158 = vst.msk [vmem:[#allocation1 + $0x30] sm:$0xff] %vm73_vm0, %v154_v40  ;;  %172 = vst.msk [vmem:[#allocation1 + $0x38] sm:$0xff] %vm73_vm0, %v168_v41 }
  0x13   :  { %v214_v42 = vld [vmem:[#allocation1] sm:$0xff]  ;;  %v216_v43 = vld [vmem:[#allocation1 + $0x8] sm:$0xff] }
  0x14   :  { %v218_v44 = vld [vmem:[#allocation1 + $0x10] sm:$0xff]  ;;  %215 = vst [vmem:[%s330_s1] sm:$0xff] %v214_v42  ;;  %217 = vst [vmem:[%s330_s1 + $0x8] sm:$0xff] %v216_v43 }
  0x15   :  { %219 = vst [vmem:[%s330_s1 + $0x10] sm:$0xff] %v218_v44  ;;  %v220_v45 = vld [vmem:[#allocation1 + $0x18] sm:$0xff]  ;;  %v222_v46 = vld [vmem:[#allocation1 + $0x20] sm:$0xff] }
  0x16   :  { %221 = vst [vmem:[%s330_s1 + $0x18] sm:$0xff] %v220_v45  ;;  %v224_v47 = vld [vmem:[#allocation1 + $0x28] sm:$0xff]  ;;  %223 = vst [vmem:[%s330_s1 + $0x20] sm:$0xff] %v222_v46 }
  0x17   :  { %225 = vst [vmem:[%s330_s1 + $0x28] sm:$0xff] %v224_v47  ;;  %v226_v48 = vld [vmem:[#allocation1 + $0x30] sm:$0xff]  ;;  %v228_v49 = vld [vmem:[#allocation1 + $0x38] sm:$0xff] }
  0x18   :  { %227 = vst [vmem:[%s330_s1 + $0x30] sm:$0xff] %v226_v48  ;;  %229 = vst [vmem:[%s330_s1 + $0x38] sm:$0xff] %v228_v49 }

// kernel: spectral_conv2d.1
= control target key start
LH: loop header
LB: loop body
LE: loop exit
PB: predicated region body
PF: predicated region fallthrough
CT: control target
= control target key end

     0   :  { %s923_s21 = smov 0   ;;  %s925_s22 = smov 0   ;;  %s1077_s0 = inlined_call_operand.vmem [shape: f32[2,2,4,128], index: 0, kind: input, shape index: {}]   ;;  %s1078_s1 = inlined_call_operand.vmem [shape: f32[2,2,4,128], index: 1, kind: input, shape index: {}]   ;;  %s1079_s2 = inlined_call_operand.vmem [shape: f32[2,4,4,128], index: 2, kind: input, shape index: {}]   ;;  %s1080_s3 = inlined_call_operand.vmem [shape: f32[2,4,4,128], index: 3, kind: input, shape index: {}]   ;;  %s1081_s4 = inlined_call_operand.vmem [shape: f32[2,4,4,128], index: 4, kind: input, shape index: {}]   ;;  %s1082_s5 = inlined_call_operand.vmem [shape: f32[2,2,4,128], index: 5, kind: output, shape index: {0}]   ;;  %s1083_s6 = inlined_call_operand.vmem [shape: f32[2,2,4,128], index: 6, kind: output, shape index: {1}]  }
   0x1   :  { %s927_s23 = smov 0  }
   0x2 LB: > { %s29_s24 = sadd.s32 1, %s882_s22  ;;  %p807_p0 = scmp.ge.s32.totalorder %s886_s23, 1  ;;  %s886_s23 = sphi %s927_s23, %s17_s23   ;;  %s882_s22 = sphi %s925_s22, %s1085_s22   ;;  %s878_s21 = sphi %s923_s21, %s1084_s21  }
   0x3   : > { %p31_p1 = scmp.ge.s32.totalorder %s29_s24, 2  ;;  %p285_p2 = scmp.lt.s32.totalorder %s886_s23, 3 }
   0x5   : > { %s1087_s24 = smov (%p31_p1, %s29_s24), 0  ;;  %p286_p3 = pnand %p807_p0, %p285_p2 }
   0x6   : > { %p357_p4 = scmp.lt.s32.totalorder (!%p286_p3), %s878_s21, 1  ;;  %v420_v0 = vlaneseq (!%p286_p3) }
   0x7   : > { %289 = sbr.rel (%p286_p3) target bundleno = 48 (0x30), region = 40 }
   0x8   : > { %v421_v1 = vshrl.u32 (!%p286_p3), %v420_v0, 7 }
   0xa   : > { %v945_v2 = vsub.s32 (!%p286_p3), 0, %v421_v1 }
   0xe   : > { %s1089_s21 = smov (!%p357_p4, %s878_s21), 1 }
   0xf   : > { %s941_s25 = sshll.u32 %s1089_s21, 3  ;;  %s943_s26 = sshll.u32 %s1089_s21, 4 }
  0x10   : > { %s951_s29 = scalar_lea.vmem %s1077_s0, %s941_s25  ;;  %s957_s8 = scalar_lea.vmem %s1078_s1, %s941_s25 }
  0x11   : > { %s380_s11 = scalar_lea.vmem %s1079_s2, %s943_s26  ;;  %s967_s14 = scalar_lea.vmem %s1080_s3, %s943_s26  ;;  %v970_v3 = vld [vmem:[%s951_s29] sm:$0x1]  ;;  %v974_v5 = vld [vmem:[%s951_s29 + $0x1] sm:$0x1]  ;;  %v984_v15 = vld [vmem:[%s951_s29 + $0x2] sm:$0x1] }
  0x12   : > { %v413_v4 = vld [vmem:[%s957_s8] sm:$0x1]  ;;  %v460_v10 = vld [vmem:[%s957_s8 + $0x1] sm:$0x1]  ;;  %v822_v12 = vld [vmem:[%s380_s11 + $0x4] sm:$0xf]  ;;  %v447_v16 = vrot.slane %v970_v3, %v945_v2  ;;  %v497_v22 = vrot.slane %v974_v5, %v945_v2  ;;  %v547_v23 = vrot.slane %v984_v15, %v945_v2  ;;  %s1025_s17 = scalar_lea.vmem %s1081_s4, %s943_s26  ;;  %s1042_s20 = scalar_lea.vmem %s1082_s5, %s941_s25 }
  0x13   : > { %v415_v6 = vadd.f32 %v413_v4, %v970_v3  ;;  %v417_v7 = vld [vmem:[%s380_s11] sm:$0xf]  ;;  %v433_v9 = vrot.slane %v413_v4, %v945_v2  ;;  %v462_v11 = vadd.f32 %v460_v10, %v974_v5  ;;  %v823_v13 = vld [vmem:[%s967_s14 + $0x4] sm:$0xf]  ;;  %v483_v14 = vrot.slane %v460_v10, %v945_v2  ;;  %v825_v20 = vld [vmem:[%s380_s11 + $0x8] sm:$0xf]  ;;  %s409_s27 = scalar_lea.vmem %s1083_s6, %s941_s25 }
  0x14   : > { %v418_v8 = vld [vmem:[%s967_s14] sm:$0xf]  ;;  %v826_v21 = vld [vmem:[%s967_s14 + $0x8] sm:$0xf]  ;;  %v828_v30 = vld [vmem:[%s380_s11 + $0xc] sm:$0xf] }
  0x15   : > { %v423_v17 = vrot.slane %v415_v6, %v945_v2  ;;  %v438_v18 = vmul.f32 %v433_v9, %v418_v8  ;;  %v510_v19 = vld [vmem:[%s957_s8 + $0x2] sm:$0x1]  ;;  %v473_v24 = vrot.slane %v462_v11, %v945_v2  ;;  %v488_v25 = vmul.f32 %v823_v13, %v483_v14  ;;  %v999_v28 = vld [vmem:[%s951_s29 + $0x3] sm:$0x1]  ;;  %v829_v33 = vld [vmem:[%s967_s14 + $0xc] sm:$0xf] }
  0x16   : > { %v512_v26 = vadd.f32 %v510_v19, %v984_v15  ;;  %v533_v27 = vrot.slane %v510_v19, %v945_v2  ;;  %v560_v29 = vld [vmem:[%s957_s8 + $0x3] sm:$0x1]  ;;  %v1006_v35 = vld [vmem:[%s951_s29 + $0x4] sm:$0x1]  ;;  %v597_v37 = vrot.slane %v999_v28, %v945_v2  ;;  %v1014_v42 = vld [vmem:[%s951_s29 + $0x5] sm:$0x1] }
  0x17   : > { %v428_v31 = vmul.f32 %v423_v17, %v417_v7  ;;  %v562_v32 = vadd.f32 %v560_v29, %v999_v28  ;;  %v583_v34 = vrot.slane %v560_v29, %v945_v2  ;;  %v414_v36 = vld [vmem:[%s957_s8 + $0x4] sm:$0x1]  ;;  %v478_v38 = vmul.f32 %v822_v12, %v473_v24  ;;  %v461_v43 = vld [vmem:[%s957_s8 + $0x5] sm:$0x1]  ;;  %v509_v44 = vld [vmem:[%s951_s29 + $0x6] sm:$0x1] }
  0x18   : > { %v523_v39 = vrot.slane %v512_v26, %v945_v2  ;;  %v538_v40 = vmul.f32 %v826_v21, %v533_v27  ;;  %v416_v41 = vadd.f32 %v414_v36, %v1006_v35  ;;  %v437_v48 = vrot.slane %v414_v36, %v945_v2  ;;  %v511_v49 = vld [vmem:[%s957_s8 + $0x6] sm:$0x1]  ;;  %v559_v58 = vld [vmem:[%s951_s29 + $0x7] sm:$0x1]  ;;  %v419_v0 = vld [vmem:[%s1025_s17] sm:$0xf] }
  0x19   : > { %v440_v45 = vsub.f32 %v428_v31, %v438_v18  ;;  %v573_v46 = vrot.slane %v562_v32, %v945_v2  ;;  %v588_v47 = vmul.f32 %v829_v33, %v583_v34  ;;  %v490_v50 = vsub.f32 %v478_v38, %v488_v25  ;;  %v561_v59 = vld [vmem:[%s957_s8 + $0x7] sm:$0x1]  ;;  %v827_v18 = vld [vmem:[%s1025_s17 + $0x8] sm:$0xf]  ;;  %v830_v25 = vld [vmem:[%s1025_s17 + $0xc] sm:$0xf] }
  0x1a   : > { %v528_v51 = vmul.f32 %v825_v20, %v523_v39  ;;  %v427_v52 = vrot.slane %v416_v41, %v945_v2  ;;  %v463_v53 = vadd.f32 %v461_v43, %v1014_v42  ;;  %v439_v55 = vmul.f32 %v437_v48, %v418_v8  ;;  %v824_v9 = vld [vmem:[%s1025_s17 + $0x4] sm:$0xf] }
  0x1b   : > { %v578_v54 = vmul.f32 %v828_v30, %v573_v46  ;;  %v487_v56 = vrot.slane %v461_v43, %v945_v2  ;;  %v513_v57 = vadd.f32 %v511_v49, %v509_v44  ;;  %v492_v60 = vadd.f32 %v490_v50, %v440_v45 }
  0x1c   : > { %v540_v61 = vsub.f32 %v528_v51, %v538_v40  ;;  %v429_v62 = vmul.f32 %v427_v52, %v417_v7  ;;  %v477_v63 = vrot.slane %v463_v53, %v945_v2  ;;  %v537_v8 = vrot.slane %v511_v49, %v945_v2 }
  0x1d   : > { %v590_v1 = vsub.f32 %v578_v54, %v588_v47  ;;  %v489_v4 = vmul.f32 %v823_v13, %v487_v56  ;;  %v527_v6 = vrot.slane %v513_v57, %v945_v2  ;;  %v563_v17 = vadd.f32 %v561_v59, %v559_v58 }
  0x1e   : > { %v542_v10 = vadd.f32 %v540_v61, %v492_v60  ;;  %v441_v11 = vsub.f32 %v429_v62, %v439_v55  ;;  %v479_v14 = vmul.f32 %v822_v12, %v477_v63  ;;  %v539_v19 = vmul.f32 %v826_v21, %v537_v8 }
  0x1f   : > { %v529_v7 = vmul.f32 %v825_v20, %v527_v6  ;;  %v587_v13 = vrot.slane %v561_v59, %v945_v2  ;;  %v452_v24 = vmul.f32 %v447_v16, %v419_v0  ;;  %v577_v12 = vrot.slane %v563_v17, %v945_v2 }
  0x20   : > { %v592_v26 = vadd.f32 %v590_v1, %v542_v10  ;;  %v491_v27 = vsub.f32 %v479_v14, %v489_v4  ;;  %v502_v28 = vmul.f32 %v824_v9, %v497_v22  ;;  %v552_v20 = vmul.f32 %v827_v18, %v547_v23 }
  0x21   : > { %v541_v29 = vsub.f32 %v529_v7, %v539_v19  ;;  %v589_v32 = vmul.f32 %v829_v33, %v587_v13  ;;  %v454_v34 = vadd.f32 %v452_v24, %v428_v31  ;;  %v579_v3 = vmul.f32 %v828_v30, %v577_v12 }
  0x22   : > { %608 = vst [vmem:[%s1042_s20] sm:$0xf] %v592_v26  ;;  %v493_v21 = vadd.f32 %v491_v27, %v441_v11  ;;  %v504_v16 = vadd.f32 %v502_v28, %v478_v38  ;;  %v602_v36 = vmul.f32 %v830_v25, %v597_v37  ;;  %v554_v39 = vadd.f32 %v552_v20, %v528_v51 }
  0x23   : > { %v451_v40 = vrot.slane %v1006_v35, %v945_v2  ;;  %v501_v5 = vrot.slane %v1014_v42, %v945_v2  ;;  %v551_v22 = vrot.slane %v509_v44, %v945_v2  ;;  %v591_v33 = vsub.f32 %v579_v3, %v589_v32 }
  0x24   : > { %v543_v31 = vadd.f32 %v541_v29, %v493_v21  ;;  %v506_v15 = vadd.f32 %v504_v16, %v454_v34  ;;  %v604_v23 = vadd.f32 %v602_v36, %v578_v54  ;;  %v601_v38 = vrot.slane %v559_v58, %v945_v2 }
  0x25   : > { %v453_v41 = vmul.f32 %v451_v40, %v419_v0  ;;  %v503_v43 = vmul.f32 %v824_v9, %v501_v5  ;;  %v553_v30 = vmul.f32 %v827_v18, %v551_v22 }
  0x26   : > { %v593_v37 = vadd.f32 %v591_v33, %v543_v31  ;;  %v556_v45 = vadd.f32 %v554_v39, %v506_v15  ;;  %v603_v44 = vmul.f32 %v830_v25, %v601_v38 }
  0x27   : > { %v455_v35 = vadd.f32 %v453_v41, %v429_v62  ;;  %v505_v42 = vadd.f32 %v503_v43, %v479_v14  ;;  %v555_v46 = vadd.f32 %v553_v30, %v529_v7 }
  0x28   : > { %609 = vst [vmem:[%s1042_s20 + $0x4] sm:$0xf] %v593_v37  ;;  %v606_v47 = vadd.f32 %v604_v23, %v556_v45  ;;  %v605_v49 = vadd.f32 %v603_v44, %v579_v3 }
  0x29   : > { %v507_v48 = vadd.f32 %v505_v42, %v455_v35 }
  0x2a   : > { %610 = vst [vmem:[%s409_s27] sm:$0xf] %v606_v47 }
  0x2b   : > { %v557_v50 = vadd.f32 %v555_v46, %v507_v48 }
  0x2d   : > { %v607_v51 = vadd.f32 %v605_v49, %v557_v50 }
  0x2f   : > { %611 = vst [vmem:[%s409_s27 + $0x4] sm:$0xf] %v607_v51 }
  0x30 PF: > { %s17_s23 = sadd.s32 1, %s886_s23   ;;  %s1084_s21 = smov %s882_s22 }
  0x31   : > { %p14_p5 = scmp.ge.s32.totalorder %s17_s23, 4   ;;  %s1085_s22 = smov %s1087_s24 }
  0x33   :  { %16 = sbr.rel (!%p14_p5) target bundleno = 2 (0x2), region = 103 }

</bundles_post_ra>
